<compile_context>
chip_gen: v7x
topology: tpu7x:2x2x1
jax: 0.10.0
libtpu: 0.0.40
codegen_flags: <defaults>
</compile_context>

<pallas_src>
import functools

import jax
import jax.numpy as jnp
from jax import lax
from jax.experimental import pallas as pl
from jax.experimental.pallas import tpu as pltpu

_LANE = 128
_SUBLANE = 8


def _fold_rows(v, tr):
    """Reduce a (tr, 128) f32 value to an (8, 128) partial sum.

    When tr % 8 == 0 this is a vreg-aligned reshape + leading-axis sum (pure VPU adds).
    The fallback only triggers when the whole sample fits one tile whose row count is
    not a multiple of 8 (tiny inputs), where performance is irrelevant.
    """
    if tr % _SUBLANE == 0:
        return v.reshape(tr // _SUBLANE, _SUBLANE, _LANE).sum(axis=0)
    col = jnp.sum(v, axis=0, keepdims=True)                      # (1, 128)
    row_id = lax.broadcasted_iota(jnp.int32, (_SUBLANE, _LANE), 0)
    return jnp.where(row_id == 0, jnp.broadcast_to(col, (_SUBLANE, _LANE)), 0.0)


def _dice_partial_kernel(x_ref, t_ref, prod_ref, tot_ref, *, rows, tr):
    """Grid = (B, num_row_tiles).  One step == one (tr, 128) tile of one sample.

    x_ref, t_ref       : (1, tr, 128) VMEM tiles of logits / targets (any dtype).
    prod_ref, tot_ref  : (1, 1, 8, 128) per-tile partial sums of s*t and s+t.
    """
    x = x_ref[0].astype(jnp.float32)
    tgt = t_ref[0].astype(jnp.float32)

    # Single-transcendental sigmoid (one EUP op instead of exp + reciprocal).
    s = 0.5 * (jnp.tanh(0.5 * x) + 1.0)

    prod = s * tgt
    tot = s + tgt

    if rows % tr != 0:
        # Last row-tile of each sample is partial: Pallas fills the out-of-bounds part
        # of the block with garbage, so zero BOTH terms for out-of-range rows.
        k = pl.program_id(1)
        valid = lax.broadcasted_iota(jnp.int32, (tr, _LANE), 0) < (rows - k * tr)
        prod = jnp.where(valid, prod, 0.0)
        tot = jnp.where(valid, tot, 0.0)

    prod_ref[0, 0] = _fold_rows(prod, tr)
    tot_ref[0, 0] = _fold_rows(tot, tr)


def dice_testing_score(inputs, targets, smooth=1.0, row_tile=2048):
    """Equivalent of DiceTestingScore().forward(inputs, targets, smooth).

    inputs, targets: (B, ...) arrays (e.g. NCHW, same as PyTorch).  Inputs may be
    bf16 (streamed as-is; math is f32 in-kernel).
    Returns a float32 scalar: sum over the batch of (1 - dice_i).
    """
    B = inputs.shape[0]
    N = 1
    for d in inputs.shape[1:]:
        N *= d

    rows = (N + _LANE - 1) // _LANE

    x = inputs.reshape(B, N)
    t = targets.reshape(B, N)
    if N % _LANE != 0:
        # Pad only to the next 128-lane multiple (needed for the (B, rows, 128) view).
        # sigmoid(-1e30) == 0 exactly (also after bf16/f16 rounding), targets pad == 0,
        # so padded elements contribute nothing to any dice term.
        pad = rows * _LANE - N
        x = jnp.pad(x, ((0, 0), (0, pad)), constant_values=-1e30)
        t = jnp.pad(t, ((0, 0), (0, pad)), constant_values=0)
    x = x.reshape(B, rows, _LANE)
    t = t.reshape(B, rows, _LANE)

    if rows <= row_tile:
        tr = rows  # single tile; block dim equals the full axis (legal even if not %8)
    else:
        tr = max(_SUBLANE, (int(row_tile) // _SUBLANE) * _SUBLANE)  # multiple of 8
    num_tiles = (rows + tr - 1) // tr

    kernel = functools.partial(_dice_partial_kernel, rows=rows, tr=tr)
    part_shape = jax.ShapeDtypeStruct((B, num_tiles, _SUBLANE, _LANE), jnp.float32)

    prod_part, tot_part = pl.pallas_call(
        kernel,
        out_shape=(part_shape, part_shape),
        grid_spec=pltpu.PrefetchScalarGridSpec(
            num_scalar_prefetch=0,
            grid=(B, num_tiles),
            in_specs=[
                pl.BlockSpec((1, tr, _LANE), lambda i, k: (i, k, 0)),
                pl.BlockSpec((1, tr, _LANE), lambda i, k: (i, k, 0)),
            ],
            out_specs=[
                pl.BlockSpec((1, 1, _SUBLANE, _LANE), lambda i, k: (i, k, 0, 0)),
                pl.BlockSpec((1, 1, _SUBLANE, _LANE), lambda i, k: (i, k, 0, 0)),
            ],
        ),
        compiler_params=pltpu.CompilerParams(
            # Every grid step is independent (per-tile partial outputs), so both axes
            # are parallel -> v7x megacore stays busy even for small batch sizes.
            dimension_semantics=("parallel", "parallel"),
            # ~4 MiB actually needed at tr=2048 f32; stay well under v7x's budget.
            vmem_limit_bytes=32 * 1024 * 1024,
        ),
    )(x, t)

    # Tiny epilogue in plain JAX (partials are ~0.4% of the input bytes).
    intersection = jnp.sum(prod_part, axis=(1, 2, 3))   # (B,) == sum(sigmoid(x) * t)
    total = jnp.sum(tot_part, axis=(1, 2, 3))           # (B,) == sum(sigmoid(x)) + sum(t)
    smooth = jnp.float32(smooth)
    dice = (2.0 * intersection + smooth) / (total + smooth)
    return jnp.sum(1.0 - dice)


def _reference(inputs, targets, smooth=1.0):
    """Pure-JAX reference mirroring the PyTorch loop."""
    s = jax.nn.sigmoid(inputs.astype(jnp.float32))
    t = targets.astype(jnp.float32)
    total = jnp.float32(0.0)
    for i in range(inputs.shape[0]):
        si = s[i].reshape(-1)
        ti = t[i].reshape(-1)
        inter = jnp.sum(si * ti)
        dice = (2.0 * inter + smooth) / (jnp.sum(si) + jnp.sum(ti) + smooth)
        total = total + (1.0 - dice)
    return total


if __name__ == "__main__":
    key = jax.random.PRNGKey(0)
    k1, k2, k3, k4 = jax.random.split(key, 4)

    # Standard test shape (N = 1024, already a multiple of 128 -> zero-copy path).
    B, C, H, W = 2, 4, 16, 16
    inputs = jax.random.normal(k1, (B, C, H, W), dtype=jnp.float32)
    targets = (jax.random.uniform(k2, (B, C, H, W)) > 0.5).astype(jnp.float32)

    result = jax.block_until_ready(dice_testing_score(inputs, targets, smooth=1.0))
    ref = _reference(inputs, targets, smooth=1.0)
    assert jnp.allclose(result, ref, rtol=1e-4, atol=1e-4), (result, ref)

    # Ragged shape (N = 3*7*5 = 105, NOT a multiple of 128) exercises the lane-pad path.
    inputs2 = jax.random.normal(k3, (2, 3, 7, 5), dtype=jnp.float32)
    targets2 = (jax.random.uniform(k4, (2, 3, 7, 5)) > 0.5).astype(jnp.float32)
    result2 = jax.block_until_ready(dice_testing_score(inputs2, targets2, smooth=1.0))
    ref2 = _reference(inputs2, targets2, smooth=1.0)
    assert jnp.allclose(result2, ref2, rtol=1e-4, atol=1e-4), (result2, ref2)

    # bf16 streaming path (half the HBM traffic); compare against an f32 reference
    # computed from the same bf16-rounded values.
    x_bf = inputs.astype(jnp.bfloat16)
    t_bf = targets.astype(jnp.bfloat16)
    result3 = jax.block_until_ready(dice_testing_score(x_bf, t_bf, smooth=1.0))
    ref3 = _reference(x_bf.astype(jnp.float32), t_bf.astype(jnp.float32), smooth=1.0)
    assert jnp.allclose(result3, ref3, rtol=1e-3, atol=1e-3), (result3, ref3)

    print("KERNEL_OK")
</pallas_src>

<mosaic_0001>
module attributes {stable_mosaic.version = 11 : i64} {
  func.func @_dice_partial_kernel(%arg0: i32, %arg1: i32, %arg2: memref<1x8x128xf32, #tpu.memory_space<vmem>>, %arg3: memref<1x8x128xf32, #tpu.memory_space<vmem>>, %arg4: memref<1x1x8x128xf32, #tpu.memory_space<vmem>>, %arg5: memref<1x1x8x128xf32, #tpu.memory_space<vmem>>) attributes {dimension_semantics = [#tpu.dimension_semantics<parallel>, #tpu.dimension_semantics<parallel>], iteration_bounds = array<i64: 2, 1>, scalar_prefetch = 0 : i64, scratch_operands = 0 : i64, tpu.core_type = #tpu.core_type<tc>, window_params = [{transform_indices = @transform_0, window_bounds = array<i64: 1, 8, 128>}, {transform_indices = @transform_1, window_bounds = array<i64: 1, 8, 128>}, {transform_indices = @transform_2, window_bounds = array<i64: 1, 1, 8, 128>}, {transform_indices = @transform_3, window_bounds = array<i64: 1, 1, 8, 128>}]} {
    %c0 = arith.constant 0 : index
    %c0_0 = arith.constant 0 : index
    %c0_1 = arith.constant 0 : index
    %0 = vector.load %arg2[%c0, %c0_0, %c0_1] : memref<1x8x128xf32, #tpu.memory_space<vmem>>, vector<1x8x128xf32>
    %1 = vector.shape_cast %0 : vector<1x8x128xf32> to vector<8x128xf32>
    %c0_2 = arith.constant 0 : index
    %c0_3 = arith.constant 0 : index
    %c0_4 = arith.constant 0 : index
    %2 = vector.load %arg3[%c0_2, %c0_3, %c0_4] : memref<1x8x128xf32, #tpu.memory_space<vmem>>, vector<1x8x128xf32>
    %3 = vector.shape_cast %2 : vector<1x8x128xf32> to vector<8x128xf32>
    %cst = arith.constant 5.000000e-01 : f32
    %4 = vector.broadcast %cst : f32 to vector<8x128xf32>
    %5 = arith.mulf %4, %1 : vector<8x128xf32>
    %6 = math.tanh %5 : vector<8x128xf32>
    %cst_5 = arith.constant 1.000000e+00 : f32
    %7 = vector.broadcast %cst_5 : f32 to vector<8x128xf32>
    %8 = arith.addf %6, %7 : vector<8x128xf32>
    %cst_6 = arith.constant 5.000000e-01 : f32
    %9 = vector.broadcast %cst_6 : f32 to vector<8x128xf32>
    %10 = arith.mulf %9, %8 : vector<8x128xf32>
    %11 = arith.mulf %10, %3 : vector<8x128xf32>
    %12 = arith.addf %10, %3 : vector<8x128xf32>
    %13 = vector.shape_cast %11 : vector<8x128xf32> to vector<1x8x128xf32>
    %cst_7 = arith.constant dense<0.000000e+00> : vector<8x128xf32>
    %14 = vector.multi_reduction <add>, %13, %cst_7 [0] : vector<1x8x128xf32> to vector<8x128xf32>
    %c0_8 = arith.constant 0 : index
    %c0_9 = arith.constant 0 : index
    %c0_10 = arith.constant 0 : index
    %c0_11 = arith.constant 0 : index
    %15 = vector.load %arg4[%c0_8, %c0_9, %c0_10, %c0_11] : memref<1x1x8x128xf32, #tpu.memory_space<vmem>>, vector<1x1x8x128xf32>
    %16 = vector.shape_cast %15 : vector<1x1x8x128xf32> to vector<8x128xf32>
    %17 = vector.shape_cast %14 : vector<8x128xf32> to vector<1x1x8x128xf32>
    tpu.vector_store %arg4[%c0_8, %c0_9, %c0_10, %c0_11], %17 {strides = array<i32>} : memref<1x1x8x128xf32, #tpu.memory_space<vmem>>, vector<1x1x8x128xf32>,
    %18 = vector.shape_cast %12 : vector<8x128xf32> to vector<1x8x128xf32>
    %cst_12 = arith.constant dense<0.000000e+00> : vector<8x128xf32>
    %19 = vector.multi_reduction <add>, %18, %cst_12 [0] : vector<1x8x128xf32> to vector<8x128xf32>
    %c0_13 = arith.constant 0 : index
    %c0_14 = arith.constant 0 : index
    %c0_15 = arith.constant 0 : index
    %c0_16 = arith.constant 0 : index
    %20 = vector.load %arg5[%c0_13, %c0_14, %c0_15, %c0_16] : memref<1x1x8x128xf32, #tpu.memory_space<vmem>>, vector<1x1x8x128xf32>
    %21 = vector.shape_cast %20 : vector<1x1x8x128xf32> to vector<8x128xf32>
    %22 = vector.shape_cast %19 : vector<8x128xf32> to vector<1x1x8x128xf32>
    tpu.vector_store %arg5[%c0_13, %c0_14, %c0_15, %c0_16], %22 {strides = array<i32>} : memref<1x1x8x128xf32, #tpu.memory_space<vmem>>, vector<1x1x8x128xf32>,
    return
  }
  func.func @transform_0(%arg0: i32, %arg1: i32) -> (i32, i32, i32) {
    %c0_i32 = arith.constant 0 : i32
    %c0_i32_0 = arith.constant 0 : i32
    return %arg0, %arg1, %c0_i32 : i32, i32, i32
  }
  func.func @transform_1(%arg0: i32, %arg1: i32) -> (i32, i32, i32) {
    %c0_i32 = arith.constant 0 : i32
    %c0_i32_0 = arith.constant 0 : i32
    return %arg0, %arg1, %c0_i32 : i32, i32, i32
  }
  func.func @transform_2(%arg0: i32, %arg1: i32) -> (i32, i32, i32, i32) {
    %c0_i32 = arith.constant 0 : i32
    %c0_i32_0 = arith.constant 0 : i32
    %c0_i32_1 = arith.constant 0 : i32
    return %arg0, %arg1, %c0_i32, %c0_i32_0 : i32, i32, i32, i32
  }
  func.func @transform_3(%arg0: i32, %arg1: i32) -> (i32, i32, i32, i32) {
    %c0_i32 = arith.constant 0 : i32
    %c0_i32_0 = arith.constant 0 : i32
    %c0_i32_1 = arith.constant 0 : i32
    return %arg0, %arg1, %c0_i32, %c0_i32_0 : i32, i32, i32, i32
  }
}

</mosaic_0001>

<bundles_post_ra>
// kernel: tpu_custom_call.1
= control target key start
LH: loop header
LB: loop body
LE: loop exit
PB: predicated region body
PF: predicated region fallthrough
CT: control target
= control target key end

     0   :  { %9 = vsyncpa [#allocation3], 0  ;;  %s985_s0 = inlined_call_operand.hbm [shape: f32[2,8,128], index: 0, kind: input, shape index: {}]   ;;  %s986_s1 = inlined_call_operand.hbm [shape: f32[2,8,128], index: 1, kind: input, shape index: {}]   ;;  %s987_s2 = inlined_call_operand.hbm [shape: f32[2,1,8,128], index: 2, kind: output, shape index: {0}]   ;;  %s988_s3 = inlined_call_operand.hbm [shape: f32[2,1,8,128], index: 3, kind: output, shape index: {1}]  }
   0x1   :  { %11 = vsyncpa [#allocation3 + $0x1], 0 }
   0x2   :  { %12 = vsyncpa [#allocation6], 0 }
   0x3   :  { %14 = vsyncpa [#allocation6 + $0x1], 0 }
   0x4   :  { %15 = vsyncpa [#allocation4], 0 }
   0x5   :  { %17 = vsyncpa [#allocation4 + $0x1], 0 }
   0x6   :  { %18 = vsyncpa [#allocation9], 0 }
   0x7   :  { %20 = vsyncpa [#allocation9 + $0x1], 0  ;;  %s736_s12 = smov 0   ;;  %s738_s13 = smov 0  }
   0x8   :  { %s740_s14 = smov 0   ;;  %s742_s15 = smov 0  }
   0x9   :  { %s744_s16 = smov 0   ;;  %s746_s17 = smov 0  }
   0xa LB: > { %s439_s18 = sadd.s32 4294967295, %s710_s17   ;;  %s440_s19 = sadd.s32 4294967294, %s710_s17   ;;  %s710_s17 = sphi %s746_s17, %s26_s17   ;;  %s706_s16 = sphi %s744_s16, %s1008_s16   ;;  %s702_s15 = sphi %s742_s15, %s1007_s15   ;;  %s698_s14 = sphi %s740_s14, %s1006_s14   ;;  %s694_s13 = sphi %s738_s13, %s1005_s13   ;;  %s690_s12 = sphi %s736_s12, %s1004_s12  }
   0xb   : > { %s38_s20 = sadd.s32 1, %s706_s16  ;;  %s47_s21 = sadd.s32 1, %s698_s14 }
   0xc   : > { %p40_p0 = scmp.ge.s32.totalorder %s38_s20, 2  ;;  %p54_p1 = scmp.ne.s32.totalorder %s698_s14, %s694_s13 }
   0xd   : > { %p55_p2 = scmp.eq.s32.totalorder %s710_s17, 0  ;;  %p60_p3 = scmp.ne.s32.totalorder %s694_s13, %s690_s12 }
   0xe   : > { %s1010_s20 = smov (%p40_p0, %s38_s20), 0  ;;  %p61_p5 = scmp.eq.s32.totalorder %s439_s18, 0 }
   0xf   : > { %p777_p4 = por %p55_p2, %p54_p1  ;;  %s42_s23 = ssub.s32 %s706_s16, %s1010_s20 }
  0x10   : > { %p114_p6 = scmp.eq.s32.totalorder %s439_s18, 1  ;;  %p45_p7 = scmp.eq.s32.totalorder %s42_s23, 0 }
  0x11   : > { %p783_p8 = por %p61_p5, %p60_p3  ;;  %p120_p10 = scmp.eq.s32.totalorder %s440_s19, 1 }
  0x12   : > { %p787_p9 = por %p114_p6, %p54_p1  ;;  %p480_p13 = scmp.lt.s32.totalorder %s710_s17, 2 }
  0x13   : > { %s992_s24 = scalar_select %p783_p8, 1, 0 }
  0x14   : > { %s993_s25 = scalar_select %p787_p9, 1, 0 }
  0x15   : > { %s792_s26 = scalar_select %p45_p7, %s698_s14, %s47_s21  }
  0x16   : > { %p794_p11 = por %p120_p10, %p60_p3  ;;  %s801_s28 = sand.u32 1, %s698_s14  }
  0x17   : > { %s443_s29 = sshll.u32 %s801_s28, 3  ;;  %s444_s30 = sshll.u32 %s706_s16, 7 }
  0x18   : > { %s994_s27 = scalar_select %p794_p11, 1, 0 }
  0x19   : > { %s810_s6 = scalar_lea.hbm %s985_s0, %s444_s30  ;;  %s172_s7 = scalar_lea.vmem [#allocation2], %s443_s29 }
  0x1a   : > { %s180_s8 = sshll.u32 %s172_s7, 4  ;;  %p818_p0 = pnand %p480_p13, %p777_p4  ;;  %s814_s8 = int_to_ptr.vmem [resolvable:$true] %s180_s8 }
  0x1b   : > { %s169_s10 = scalar_lea.sflag [#allocation3], %s801_s28  ;;  %s532_s11 = scalar_lea.hbm %s810_s6, 128 }
  0x1c   : > { %p533_p3 = scmp.ne.s32.totalorder %s810_s6, %s532_s11  ;;  %p534_p5 = pneg %p818_p0 }
  0x1d   : > { %s537_s21 = scalar_lea.hbm %s985_s0, 256  ;;  %p538_p4 = scmp.lt.u32.totalorder %s810_s6, %s985_s0 }
  0x1e   : > { %p535_p6 = pnand %p534_p5, %p533_p3  ;;  %p539_p10 = scmp.lt.u32.totalorder %s537_s21, %s532_s11 }
  0x1f   : > { %p541_p12 = scmp.lt.u32.totalorder %s532_s11, %s810_s6 }
  0x20   : > { %p536_p7 = pneg %p535_p6  ;;  %p540_p13 = por %p539_p10, %p538_p4 }
  0x22   : > { %p542_p1 = por %p541_p12, %p540_p13 }
  0x24   : > { %p543_p2 = pnand %p542_p1, %p536_p7 }
  0x26   : > { %546 = shalt.err (!%p543_p2)
}
  0x27   : > { %s547_s4 = scalar_lea.vmem %s814_s8, 128  ;;  %s712_s5 = smov [#allocation2]  }
  0x28   : > { %p548_p3 = scmp.ne.s32.totalorder %s814_s8, %s547_s4  ;;  %s552_s7 = sshll.u32 %s712_s5, 4  ;;  %s553_s7 = int_to_ptr.vmem [resolvable:$false] %s552_s7 }
  0x29   : > { %s554_s18 = scalar_lea.vmem %s553_s7, 256  ;;  %p555_p9 = scmp.lt.s32.totalorder %s814_s8, %s553_s7 }
  0x2a   : > { %p550_p6 = pnand %p548_p3, %p534_p5  ;;  %p556_p4 = scmp.lt.s32.totalorder %s554_s18, %s547_s4 }
  0x2c   : > { %p551_p11 = pneg %p550_p6  ;;  %p557_p10 = por %p556_p4, %p555_p9 }
  0x2e   : > { %p558_p12 = pnand %p557_p10, %p551_p11 }
  0x30   : > { %561 = shalt.err (!%p558_p12)
}
  0x31   : > { %469 = dma.hbm_to_vmem [thread:$0]  (!%p818_p0), %s810_s6, 128, %s814_s8, %s169_s10  }
  0x32   : > { %p996_p1 = scmp.lt.s32.totalorder %s710_s17, 3  ;;  %p997_p2 = scmp.ge.s32.totalorder %s710_s17, 1 }
  0x33   : > { %s863_s22 = scalar_lea.hbm %s986_s1, %s444_s30  ;;  %s191_s23 = scalar_lea.vmem [#allocation5], %s443_s29 }
  0x34   : > { %p854_p7 = pnand %p997_p2, %p996_p1  ;;  %s199_s4 = sshll.u32 %s191_s23, 4  ;;  %s200_s4 = int_to_ptr.vmem [resolvable:$true] %s199_s4 }
  0x35   : > { %s188_s6 = scalar_lea.sflag [#allocation6], %s801_s28  ;;  %s562_s8 = scalar_lea.hbm %s863_s22, 128 }
  0x36   : > { %s998_s11 = scalar_select %p854_p7, 1, 0 }
  0x37   : > { %p563_p9 = scmp.ne.s32.totalorder %s863_s22, %s562_s8  ;;  %s567_s30 = scalar_lea.hbm %s986_s1, 256 }
  0x38   : > { %p568_p3 = scmp.lt.u32.totalorder %s863_s22, %s986_s1  ;;  %p569_p6 = scmp.lt.u32.totalorder %s567_s30, %s562_s8 }
  0x39   : > { %p565_p11 = pnand %p563_p9, %p534_p5  ;;  %p571_p10 = scmp.lt.u32.totalorder %s562_s8, %s863_s22 }
  0x3a   : > { %p570_p4 = por %p569_p6, %p568_p3 }
  0x3b   : > { %p566_p13 = pneg %p565_p11 }
  0x3c   : > { %p572_p12 = por %p571_p10, %p570_p4 }
  0x3e   : > { %p573_p1 = pnand %p572_p12, %p566_p13 }
  0x40   : > { %576 = shalt.err (!%p573_p1)
}
  0x41   : > { %s577_s28 = scalar_lea.vmem %s200_s4, 128  ;;  %s713_s29 = smov [#allocation5]  }
  0x42   : > { %p578_p2 = scmp.ne.s32.totalorder %s200_s4, %s577_s28  ;;  %s582_s19 = sshll.u32 %s713_s29, 4  ;;  %s583_s19 = int_to_ptr.vmem [resolvable:$false] %s582_s19 }
  0x43   : > { %s584_s21 = scalar_lea.vmem %s583_s19, 256  ;;  %p585_p8 = scmp.lt.s32.totalorder %s200_s4, %s583_s19 }
  0x44   : > { %p580_p9 = pnand %p578_p2, %p534_p5  ;;  %p586_p7 = scmp.lt.s32.totalorder %s584_s21, %s577_s28 }
  0x46   : > { %p581_p11 = pneg %p580_p9  ;;  %p587_p3 = por %p586_p7, %p585_p8 }
  0x48   : > { %p588_p6 = pnand %p587_p3, %p581_p11 }
  0x4a   : > { %591 = shalt.err (!%p588_p6)
}
  0x4b   : > { %472 = dma.hbm_to_vmem [thread:$0]  (!%p818_p0), %s863_s22, 128, %s200_s4, %s188_s6  }
  0x4c   : > { %p999_p13 = scmp.ne.s32.totalorder %s998_s11, 0 }
  0x4d   : > { %s890_s23 = sand.u32 (!%p999_p13), 1, %s694_s13   ;;  %p1000_p5 = scmp.ne.s32.totalorder (!%p999_p13), %s992_s24, 0 }
  0x4e   : > { %208 = sbr.rel (%p999_p13) target bundleno = 145 (0x91), region = 28  ;;  %s448_s8 = sshll.u32 (!%p999_p13), %s890_s23, 3 }
  0x4f   : > { %s211_s10 = scalar_lea.sflag (!%p999_p13), [#allocation3], %s890_s23  ;;  %s214_s5 = scalar_lea.vmem (!%p999_p13), [#allocation2], %s448_s8 }
  0x55   : > { %673 = dma.done.wait (%p1000_p5), %s211_s10, 128  }
  0x56   : > { %675 = vsyncadd (%p1000_p5), %s211_s10, 4294967168  ;;  %s220_s9 = scalar_lea.sflag [#allocation6], %s890_s23  ;;  %s223_s22 = scalar_lea.vmem [#allocation5], %s448_s8 }
  0x57   : > { %677 = dma.done.wait (%p1000_p5), %s220_s9, 128  }
  0x58   : > { %679 = vsyncadd (%p1000_p5), %s220_s9, 4294967168  ;;  %v256_v0 = vld [vmem:[%s214_s5] sm:$0xff]  ;;  %s248_s11 = scalar_lea.vmem [#allocation7], %s448_s8  ;;  %s255_s6 = scalar_lea.vmem [#allocation8], %s448_s8  ;;  %v257_v4 = vld [vmem:[%s223_s22] sm:$0xff] }
  0x59   : > { %v258_v1 = vmul.f32 0.5, %v256_v0  ;;  %s288_s4 = sshll.u32 %s248_s11, 4  ;;  %s302_s30 = sshll.u32 %s255_s6, 4  ;;  %s904_s4 = int_to_ptr.vmem [resolvable:$true] %s288_s4  ;;  %s906_s30 = int_to_ptr.vmem [resolvable:$true] %s302_s30 }
  0x5a   : > { %s454_s7 = sshll.u32 %s702_s15, 7  ;;  %s269_s15 = scalar_lea.sflag [#allocation4], %s890_s23 }
  0x5b   : > { %530 = vtanh.f32 %v258_v1  ;;  %s911_s28 = scalar_lea.hbm %s987_s2, %s454_s7  ;;  %s916_s21 = scalar_lea.hbm %s988_s3, %s454_s7 }
  0x5c   : > { %s592_s8 = scalar_lea.vmem %s904_s4, 128  ;;  %p1001_p0 = scmp.ne.s32.totalorder %s993_s25, 0 }
  0x5d   : > { %p593_p8 = scmp.ne.s32.totalorder %s904_s4, %s592_s8  ;;  %s714_s10 = smov [#allocation7]  }
  0x5e   : > { %s596_s5 = sshll.u32 %s714_s10, 4  ;;  %s597_s5 = int_to_ptr.vmem [resolvable:$false] %s596_s5 }
  0x5f   : > { %p594_p7 = pnand %p593_p8, %p1001_p0  ;;  %s598_s9 = scalar_lea.vmem %s597_s5, 256 }
  0x60   : > { %p599_p10 = scmp.lt.s32.totalorder %s904_s4, %s597_s5  ;;  %p600_p12 = scmp.lt.s32.totalorder %s598_s9, %s592_s8 }
  0x61   : > { %p595_p4 = pneg %p594_p7 }
  0x62   : > { %p601_p1 = por %p600_p12, %p599_p10 }
  0x64   : > { %p602_p2 = pnand %p601_p1, %p595_p4 }
  0x65   : > { %v531_v2 = vpop.eup %530 }
  0x66   : > { %v260_v3 = vadd.f32 1.0, %v531_v2 }
  0x68   : > { %v261_v5 = vmul.f32 0.5, %v260_v3 }
  0x6a   : > { %v262_v6 = vmul.f32 %v261_v5, %v257_v4  ;;  %v263_v7 = vadd.f32 %v261_v5, %v257_v4 }
  0x6c   : > { %265 = vst [vmem:[%s248_s11] sm:$0xff] %v262_v6  ;;  %267 = vst [vmem:[%s255_s6] sm:$0xff] %v263_v7 }
  0x6d   : > { %605 = shalt.err (!%p602_p2)
}
  0x6e   : > { %s606_s22 = scalar_lea.hbm %s911_s28, 128  ;;  %s610_s7 = scalar_lea.hbm %s987_s2, 256 }
  0x6f   : > { %p607_p9 = scmp.ne.s32.totalorder %s911_s28, %s606_s22  ;;  %p611_p6 = scmp.lt.u32.totalorder %s911_s28, %s987_s2 }
  0x70   : > { %p612_p13 = scmp.lt.u32.totalorder %s610_s7, %s606_s22  ;;  %p614_p8 = scmp.lt.u32.totalorder %s606_s22, %s911_s28 }
  0x71   : > { %p608_p11 = pnand %p607_p9, %p1001_p0 }
  0x72   : > { %p613_p5 = por %p612_p13, %p611_p6 }
  0x73   : > { %p609_p3 = pneg %p608_p11 }
  0x74   : > { %p615_p7 = por %p614_p8, %p613_p5 }
  0x76   : > { %p616_p4 = pnand %p615_p7, %p609_p3 }
  0x78   : > { %619 = shalt.err (!%p616_p4)
}
  0x79   : > { %462 = dma.vmem_to_hbm [thread:$0]  (%p1001_p0), %s904_s4, 128, %s911_s28, %s269_s15  }
  0x7a   : > { %s274_s29 = scalar_lea.sflag [#allocation9], %s890_s23  ;;  %s620_s19 = scalar_lea.vmem %s906_s30, 128 }
  0x7b   : > { %p621_p10 = scmp.ne.s32.totalorder %s906_s30, %s620_s19  ;;  %s715_s8 = smov [#allocation8]  }
  0x7c   : > { %s624_s10 = sshll.u32 %s715_s8, 4  ;;  %s625_s10 = int_to_ptr.vmem [resolvable:$false] %s624_s10 }
  0x7d   : > { %p622_p12 = pnand %p621_p10, %p1001_p0  ;;  %s626_s5 = scalar_lea.vmem %s625_s10, 256 }
  0x7e   : > { %p627_p2 = scmp.lt.s32.totalorder %s906_s30, %s625_s10  ;;  %p628_p9 = scmp.lt.s32.totalorder %s626_s5, %s620_s19 }
  0x7f   : > { %p623_p1 = pneg %p622_p12 }
  0x80   : > { %p629_p11 = por %p628_p9, %p627_p2 }
  0x82   : > { %p630_p3 = pnand %p629_p11, %p623_p1 }
  0x84   : > { %633 = shalt.err (!%p630_p3)
}
  0x85   : > { %s634_s23 = scalar_lea.hbm %s916_s21, 128  ;;  %s638_s15 = scalar_lea.hbm %s988_s3, 256 }
  0x86   : > { %p635_p6 = scmp.ne.s32.totalorder %s916_s21, %s634_s23  ;;  %p639_p8 = scmp.lt.u32.totalorder %s916_s21, %s988_s3 }
  0x87   : > { %p640_p7 = scmp.lt.u32.totalorder %s638_s15, %s634_s23  ;;  %p642_p10 = scmp.lt.u32.totalorder %s634_s23, %s916_s21 }
  0x88   : > { %p636_p13 = pnand %p635_p6, %p1001_p0 }
  0x89   : > { %p641_p4 = por %p640_p7, %p639_p8 }
  0x8a   : > { %p637_p5 = pneg %p636_p13 }
  0x8b   : > { %p643_p12 = por %p642_p10, %p641_p4 }
  0x8d   : > { %p644_p1 = pnand %p643_p12, %p637_p5 }
  0x8f   : > { %647 = shalt.err (!%p644_p1)
}
  0x90   : > { %463 = dma.vmem_to_hbm [thread:$0]  (%p1001_p0), %s906_s30, 128, %s916_s21, %s274_s29  }
  0x91 PF: > { %s314_s11 = sand.u32 1, %s690_s12   ;;  %p1002_p2 = scmp.ne.s32.totalorder %s994_s27, 0 }
  0x92   : > { %p1003_p9 = scmp.ge.s32.totalorder %s710_s17, 2  ;;  %s315_s6 = scalar_lea.sflag [#allocation4], %s314_s11 }
  0x94   : > { %p474_p11 = pnand %p1003_p9, %p1002_p2 }
  0x96   : > { %681 = dma.done.wait (!%p474_p11), %s315_s6, 128  }
  0x97   : > { %683 = vsyncadd (!%p474_p11), %s315_s6, 4294967168  ;;  %s324_s7 = scalar_lea.sflag [#allocation9], %s314_s11 }
  0x98   : > { %685 = dma.done.wait (!%p474_p11), %s324_s7, 128  }
  0x99   : > { %687 = vsyncadd (!%p474_p11), %s324_s7, 4294967168  ;;  %s26_s17 = sadd.s32 1, %s710_s17   ;;  %s1004_s12 = smov %s694_s13 }
  0x9a   : > { %p23_p3 = scmp.ge.s32.totalorder %s26_s17, 4   ;;  %s1005_s13 = smov %s698_s14 }
  0x9b   : > { %s1006_s14 = smov %s792_s26  ;;  %s1007_s15 = smov %s706_s16 }
  0x9c   : > { %s1008_s16 = smov %s1010_s20  ;;  %25 = sbr.rel (!%p23_p3) target bundleno = 10 (0xa), region = 103 }
  0xa3   :  { %329 = vsyncpa [#allocation3], 1 }
  0xa4   :  { %331 = vsyncpa [#allocation3 + $0x1], 1 }
  0xa5   :  { %332 = vsyncpa [#allocation6], 1 }
  0xa6   :  { %334 = vsyncpa [#allocation6 + $0x1], 1 }
  0xa7   :  { %335 = vsyncpa [#allocation4], 1 }
  0xa8   :  { %337 = vsyncpa [#allocation4 + $0x1], 1 }
  0xa9   :  { %338 = vsyncpa [#allocation9], 1 }
  0xaa   :  { %340 = vsyncpa [#allocation9 + $0x1], 1 }

</bundles_post_ra>
